<compile_context>
chip_gen: v5e
topology: v5e:2x2
jax: 0.10.0
libtpu: 0.0.40
codegen_flags: <defaults>
</compile_context>

<pallas_src>
import math

import jax
import jax.numpy as jnp
from jax.experimental import pallas as pl
from jax.experimental.pallas import tpu as pltpu


def _conv_tanh_kernel(p_ref, w_ref, b_ref, o_ref):
    # p_ref: (K, L) im2col patches^T for one batch element (K = Cin*kh*kw, L = Ho*Wo)
    # w_ref: (Cout, K), b_ref: (Cout, 1), o_ref: (Cout, L)
    acc = jnp.dot(w_ref[...], p_ref[...], preferred_element_type=jnp.float32)
    o_ref[...] = jnp.tanh(acc + b_ref[...]).astype(o_ref.dtype)


def conv2d_tanh(x, w, b):
    """x: (N, Cin, H, W) f32, w: (Cout, Cin, 3, 3), b: (Cout,). Returns (N, Cout, Ho, Wo)."""
    N, C, H, W = x.shape
    Cout = w.shape[0]
    kh = kw = 3
    s = 3
    Ho = (H - kh) // s + 1
    Wo = (W - kw) // s + 1
    K = C * kh * kw
    L = Ho * Wo

    # im2col, K-major per batch (single small transpose of the INPUT, no output transpose):
    # (N, C, Ho, kh, Wo, kw) -> (N, C, kh, kw, Ho, Wo) -> (N, K, L)
    xc = x[:, :, : Ho * s, : Wo * s].reshape(N, C, Ho, kh, Wo, kw)
    pT = xc.transpose(0, 1, 3, 5, 2, 4).reshape(N, K, L)

    wmat = w.reshape(Cout, K)        # (Cout, K) — same (C, kh, kw) flattening order as pT
    bcol = b.reshape(Cout, 1)        # broadcast across lanes inside the kernel

    flops = 2 * N * L * K * Cout
    bytes_accessed = (pT.size + wmat.size + bcol.size + N * Cout * L) * 4
    cost = pl.CostEstimate(
        flops=flops, transcendentals=N * Cout * L, bytes_accessed=bytes_accessed
    )

    out = pl.pallas_call(
        _conv_tanh_kernel,
        out_shape=jax.ShapeDtypeStruct((N, Cout, L), x.dtype),
        grid=(N,),
        in_specs=[
            pl.BlockSpec((None, K, L), lambda n: (n, 0, 0)),   # per-batch patch block
            pl.BlockSpec((Cout, K), lambda n: (0, 0)),         # weights resident
            pl.BlockSpec((Cout, 1), lambda n: (0, 0)),         # bias resident
        ],
        out_specs=pl.BlockSpec((None, Cout, L), lambda n: (n, 0, 0)),  # lane-dense output
        compiler_params=pltpu.CompilerParams(
            dimension_semantics=("parallel",),
        ),
        cost_estimate=cost,
    )(pT, wmat, bcol)

    # (N, Cout, Ho*Wo) -> (N, Cout, Ho, Wo): pure reshape, no data movement (NCHW-ready).
    return out.reshape(N, Cout, Ho, Wo)


def init_params(key, cin=3, cout=32, kh=3, kw=3):
    # Deterministic init mimicking PyTorch Conv2d default (uniform +/- 1/sqrt(fan_in)).
    fan_in = cin * kh * kw
    bound = 1.0 / math.sqrt(fan_in)
    kw_key, kb_key = jax.random.split(key)
    w = jax.random.uniform(kw_key, (cout, cin, kh, kw), jnp.float32, -bound, bound)
    b = jax.random.uniform(kb_key, (cout,), jnp.float32, -bound, bound)
    return w, b


if __name__ == "__main__":
    key = jax.random.PRNGKey(0)
    kx, kp = jax.random.split(key)

    # Module's implied input: (1, 3, 64, 64); use batch=2 so the parallel grid axis
    # has >1 block (exercises megacore sharding on v7x).
    x = jax.random.normal(kx, (2, 3, 64, 64), jnp.float32)
    w, b = init_params(kp)

    y = jax.block_until_ready(conv2d_tanh(x, w, b))

    # Reference check against plain-JAX conv + tanh.
    y_ref = jnp.tanh(
        jax.lax.conv_general_dilated(
            x, w, window_strides=(3, 3), padding="VALID",
            dimension_numbers=("NCHW", "OIHW", "NCHW"),
        )
        + b.reshape(1, -1, 1, 1)
    )
    assert y.shape == (2, 32, 21, 21), y.shape
    assert jnp.allclose(y, y_ref, atol=1e-5, rtol=1e-5), float(jnp.max(jnp.abs(y - y_ref)))

    print("KERNEL_OK")
</pallas_src>

<mosaic_0001>
module attributes {stable_mosaic.version = 11 : i64} {
  func.func @_conv_tanh_kernel(%arg0: i32, %arg1: memref<1x27x441xf32, #tpu.memory_space<vmem>>, %arg2: memref<32x27xf32, #tpu.memory_space<vmem>>, %arg3: memref<32x1xf32, #tpu.memory_space<vmem>>, %arg4: memref<1x32x441xf32, #tpu.memory_space<vmem>>) attributes {dimension_semantics = [#tpu.dimension_semantics<parallel>], iteration_bounds = array<i64: 2>, scalar_prefetch = 0 : i64, scratch_operands = 0 : i64, tpu.core_type = #tpu.core_type<tc>, window_params = [{transform_indices = @transform_0, window_bounds = array<i64: 1, 27, 441>}, {pipeline_mode = #tpu.pipeline_mode<synchronous>, transform_indices = @transform_1, window_bounds = array<i64: 32, 27>}, {pipeline_mode = #tpu.pipeline_mode<synchronous>, transform_indices = @transform_2, window_bounds = array<i64: 32, 1>}, {transform_indices = @transform_3, window_bounds = array<i64: 1, 32, 441>}]} {
    %c0 = arith.constant 0 : index
    %c0_0 = arith.constant 0 : index
    %0 = vector.load %arg2[%c0, %c0_0] : memref<32x27xf32, #tpu.memory_space<vmem>>, vector<32x27xf32>
    %c0_1 = arith.constant 0 : index
    %c0_2 = arith.constant 0 : index
    %c0_3 = arith.constant 0 : index
    %1 = vector.load %arg1[%c0_1, %c0_2, %c0_3] : memref<1x27x441xf32, #tpu.memory_space<vmem>>, vector<1x27x441xf32>
    %2 = vector.shape_cast %1 : vector<1x27x441xf32> to vector<27x441xf32>
    %cst = arith.constant dense<0.000000e+00> : vector<32x441xf32>
    %3 = tpu.matmul %0, %2, %cst {dimension_numbers = #tpu.dot_dimension_numbers<[1], [0], [0], [1], [0, 0, 1, 1], [], []>} : vector<32x27xf32>, vector<27x441xf32>, vector<32x441xf32> -> vector<32x441xf32>
    %c0_4 = arith.constant 0 : index
    %c0_5 = arith.constant 0 : index
    %4 = vector.load %arg3[%c0_4, %c0_5] : memref<32x1xf32, #tpu.memory_space<vmem>>, vector<32x1xf32>
    %5 = vector.broadcast %4 : vector<32x1xf32> to vector<32x441xf32>
    %6 = arith.addf %3, %5 : vector<32x441xf32>
    %7 = math.tanh %6 : vector<32x441xf32>
    %c0_6 = arith.constant 0 : index
    %c0_7 = arith.constant 0 : index
    %c0_8 = arith.constant 0 : index
    %8 = vector.load %arg4[%c0_6, %c0_7, %c0_8] : memref<1x32x441xf32, #tpu.memory_space<vmem>>, vector<1x32x441xf32>
    %9 = vector.shape_cast %8 : vector<1x32x441xf32> to vector<32x441xf32>
    %10 = vector.shape_cast %7 : vector<32x441xf32> to vector<1x32x441xf32>
    tpu.vector_store %arg4[%c0_6, %c0_7, %c0_8], %10 {strides = array<i32>} : memref<1x32x441xf32, #tpu.memory_space<vmem>>, vector<1x32x441xf32>,
    return
  }
  func.func @transform_0(%arg0: i32) -> (i32, i32, i32) {
    %c0_i32 = arith.constant 0 : i32
    %c0_i32_0 = arith.constant 0 : i32
    %c0_i32_1 = arith.constant 0 : i32
    return %arg0, %c0_i32, %c0_i32_0 : i32, i32, i32
  }
  func.func @transform_1(%arg0: i32) -> (i32, i32) {
    %c0_i32 = arith.constant 0 : i32
    %c0_i32_0 = arith.constant 0 : i32
    %c0_i32_1 = arith.constant 0 : i32
    return %c0_i32, %c0_i32_0 : i32, i32
  }
  func.func @transform_2(%arg0: i32) -> (i32, i32) {
    %c0_i32 = arith.constant 0 : i32
    %c0_i32_0 = arith.constant 0 : i32
    %c0_i32_1 = arith.constant 0 : i32
    return %c0_i32, %c0_i32_0 : i32, i32
  }
  func.func @transform_3(%arg0: i32) -> (i32, i32, i32) {
    %c0_i32 = arith.constant 0 : i32
    %c0_i32_0 = arith.constant 0 : i32
    %c0_i32_1 = arith.constant 0 : i32
    return %arg0, %c0_i32, %c0_i32_0 : i32, i32, i32
  }
}

</mosaic_0001>

<bundles_post_ra>
// kernel: tpu_custom_call.1
= control target key start
LH: loop header
LB: loop body
LE: loop exit
PB: predicated region body
PF: predicated region fallthrough
CT: control target
= control target key end

     0   :  { %8 = vsyncpa [#allocation3], 0  ;;  %s815_s0 = inlined_call_operand.vmem [shape: f32[2,27,441], index: 0, kind: input, shape index: {}]   ;;  %s816_s1 = inlined_call_operand.vmem [shape: f32[32,27], index: 1, kind: input, shape index: {}]   ;;  %s817_s2 = inlined_call_operand.vmem [shape: f32[32,1], index: 2, kind: input, shape index: {}]   ;;  %s818_s3 = inlined_call_operand.hbm [shape: f32[2,32,441], index: 3, kind: output, shape index: {}]  }
   0x1   :  { %10 = vsyncpa [#allocation3 + $0x1], 0  ;;  %s663_s12 = smov 0   ;;  %s665_s13 = smov 0  }
   0x2   :  { %s667_s14 = smov 0   ;;  %s669_s15 = smov 0  }
   0x3 LB: > { %s684_s16 = sadd.s32 4294967295, %s638_s15   ;;  %s466_s17 = sadd.s32 4294967294, %s638_s15   ;;  %s638_s15 = sphi %s669_s15, %s824_s15   ;;  %s634_s14 = sphi %s667_s14, %s823_s14   ;;  %s630_s13 = sphi %s665_s13, %s822_s13   ;;  %s626_s12 = sphi %s663_s12, %s821_s12  }
   0x4   : > { %s688_s18 = sadd.s32 1, %s638_s15   ;;  %s91_s19 = sadd.s32 1, %s634_s14 }
   0x5   : > { %s88_s20 = ssub.s32 %s638_s15, %s688_s18  ;;  %p101_p0 = scmp.ne.s32.totalorder %s634_s14, %s630_s13 }
   0x6   : > { %p89_p1 = scmp.eq.s32.totalorder %s88_s20, 0  ;;  %p102_p2 = scmp.eq.s32.totalorder %s684_s16, 1 }
   0x7   : > { %p107_p3 = scmp.ne.s32.totalorder %s630_s13, %s626_s12  ;;  %p108_p4 = scmp.eq.s32.totalorder %s466_s17, 1 }
   0x8   : > { %s699_s21 = scalar_select %p89_p1, %s634_s14, %s91_s19  }
   0x9   : > { %p701_p5 = por %p102_p2, %p101_p0  ;;  %p705_p6 = por %p108_p4, %p107_p3 }
   0xa   : > { %p469_p7 = scmp.ge.s32.totalorder %s638_s15, 1  ;;  %p140_p8 = scmp.lt.s32.totalorder %s638_s15, 3 }
   0xc   : > { %p141_p9 = pnand %p469_p7, %p140_p8 }
   0xd   : > { %p164_p10 = scmp.lt.s32.totalorder (!%p141_p9), %s684_s16, 1  ;;  %s596_s19 = scalar_lea.hbm (!%p141_p9), %s818_s3, 256 }
   0xe   : > { %144 = sbr.rel (%p141_p9) target bundleno = 203 (0xcb), region = 32 }
  0x13   : > { %v640_v0 = vmov 0   ;;  %v189_v1 = vld [vmem:[%s817_s2] sm:$0xff]  ;;  %s165_s26 = scalar_select %p164_p10, %s684_s16, 1  ;;  %vm226_vm0 = vcmask 1042432   ;;  %vm213_vm1 = vcmask 220160   ;;  %v191_v19 = vld [vmem:[%s817_s2 + $0x10] sm:$0xff] }
  0x14   : > { %542 = vset.pattern.permute.xlu0 %v640_v0  ;;  %543 = vset.pattern.permute.xlu1 %v640_v0  ;;  %v169_v18 = vld [vmem:[%s816_s1] sm:$0xff]  ;;  %v190_v20 = vld [vmem:[%s817_s2 + $0x8] sm:$0xff]  ;;  %v192_v22 = vld [vmem:[%s817_s2 + $0x18] sm:$0xff]  ;;  %vm374_vm2 = vcmask 465920  }
  0x15   : > { %195 = vperm.xlu0 %542, %v189_v1   ;;  %s498_s27 = sshll.u32 %s165_s26, 7  ;;  %205 = vperm.xlu1 %543, %v191_v19   ;;  %v170_v21 = vld [vmem:[%s816_s1 + $0x8] sm:$0xff]  ;;  %v171_v23 = vld [vmem:[%s816_s1 + $0x10] sm:$0xff]  ;;  %v172_v24 = vld [vmem:[%s816_s1 + $0x18] sm:$0xff] }
  0x16   : > { %s168_s30 = scalar_lea.vmem %s815_s0, %s498_s27  ;;  %s161_s27 = sand.u32 1, %s630_s13  }
  0x17   : > { %v185_v2 = vld [vmem:[%s168_s30 + $0x60] sm:$0x7]  ;;  %v186_v3 = vld [vmem:[%s168_s30 + $0x68] sm:$0x7]  ;;  %v187_v4 = vld [vmem:[%s168_s30 + $0x70] sm:$0x7] }
  0x18   : > { %473 = vmatpush.msk.msra.mxu0 %vm226_vm0, %v185_v2  ;;  %478 = vmatpush.msk.msra.mxu1 %vm226_vm0, %v186_v3  ;;  %v188_v5 = vld [vmem:[%s168_s30 + $0x78] sm:$0x7]  ;;  %v181_v6 = vld [vmem:[%s168_s30 + $0x40] sm:$0xff]  ;;  %v182_v7 = vld [vmem:[%s168_s30 + $0x48] sm:$0xff]  ;;  %s470_s28 = sshll.u32 %s161_s27, 7  ;;  %s389_s8 = scalar_lea.sflag [#allocation3], %s161_s27 }
  0x19   : > { %483 = vmatpush.msk.msra.mxu2 %vm226_vm0, %v187_v4  ;;  %488 = vmatpush.msk.msra.mxu3 %vm226_vm0, %v188_v5  ;;  %v183_v8 = vld [vmem:[%s168_s30 + $0x50] sm:$0xff]  ;;  %v184_v9 = vld [vmem:[%s168_s30 + $0x58] sm:$0xff]  ;;  %v177_v10 = vld [vmem:[%s168_s30 + $0x20] sm:$0xff]  ;;  %s759_s29 = scalar_lea.vmem [#allocation2], %s470_s28 }
  0x1a   : > { %252 = vmatpush.msra.mxu0 %v181_v6  ;;  %281 = vmatpush.msra.mxu1 %v182_v7  ;;  %v178_v11 = vld [vmem:[%s168_s30 + $0x28] sm:$0xff]  ;;  %v179_v12 = vld [vmem:[%s168_s30 + $0x30] sm:$0xff]  ;;  %v180_v13 = vld [vmem:[%s168_s30 + $0x38] sm:$0xff] }
  0x1b   : > { %310 = vmatpush.msra.mxu2 %v183_v8  ;;  %339 = vmatpush.msra.mxu3 %v184_v9  ;;  %v173_v14 = vld [vmem:[%s168_s30] sm:$0xff]  ;;  %v174_v15 = vld [vmem:[%s168_s30 + $0x8] sm:$0xff]  ;;  %v175_v16 = vld [vmem:[%s168_s30 + $0x10] sm:$0xff] }
  0x1c   : > { %253 = vmatpush.msra.mxu0 %v177_v10  ;;  %282 = vmatpush.msra.mxu1 %v178_v11  ;;  %v176_v17 = vld [vmem:[%s168_s30 + $0x18] sm:$0xff]  ;;  %s499_s30 = sshll.u32 %s684_s16, 7  ;;  %s401_s16 = sshll.u32 %s759_s29, 4  ;;  %s402_s16 = int_to_ptr.vmem [resolvable:$true] %s401_s16 }
  0x1d   : > { %311 = vmatpush.msra.mxu2 %v179_v12  ;;  %340 = vmatpush.msra.mxu3 %v180_v13  ;;  %s400_s6 = scalar_lea.hbm %s818_s3, %s499_s30 }
  0x1e   : > { %254 = vmatpush.msra.mxu0 %v173_v14  ;;  %283 = vmatpush.msra.mxu1 %v174_v15  ;;  %s403_s7 = sshll.u32 %s400_s6, 4  ;;  %s404_s7 = int_to_ptr.hbm [resolvable:$true] %s403_s7 }
  0x1f   : > { %312 = vmatpush.msra.mxu2 %v175_v16  ;;  %341 = vmatpush.msra.mxu3 %v176_v17  ;;  %s590_s9 = sshra.s32 %s404_s7, 4  ;;  %s591_s9 = int_to_ptr.hbm [resolvable:$true] %s590_s9 }
  0x20   : > { %474 = vmatmul.msk.f32.vlgmr.msra.gmra.mxu0 %vm213_vm1, %v169_v18  ;;  %479 = vmatmul.msk.f32.vlgmr.msra.gmra.mxu1 %vm213_vm1, %v169_v18  ;;  %s592_s10 = scalar_lea.hbm %s591_s9, 128  ;;  %p597_p0 = scmp.lt.s32.totalorder %s591_s9, %s818_s3 }
  0x21   : > { %484 = vmatmul.msk.f32.vlgmr.msra.gmra.mxu2 %vm213_vm1, %v169_v18  ;;  %489 = vmatmul.msk.f32.vlgmr.msra.gmra.mxu3 %vm213_vm1, %v169_v18  ;;  %p593_p11 = scmp.ne.s32.totalorder %s591_s9, %s592_s10  ;;  %p598_p1 = scmp.lt.s32.totalorder %s596_s19, %s592_s10 }
  0x22   : > { %200 = vperm.xlu0 %542, %v190_v20   ;;  %210 = vperm.xlu1 %543, %v192_v22  }
  0x23   : > { %p594_p12 = pnand %p593_p11, %p701_p5  ;;  %p599_p2 = por %p598_p1, %p597_p0 }
  0x25   : > { %p595_p13 = pneg %p594_p12 }
  0x27   : > { %p600_p3 = pnand %p599_p2, %p595_p13 }
  0x28   : > { %475 = vmatmul.msk.f32.gmra.mxu0 %vm213_vm1, %v170_v21  ;;  %480 = vmatmul.msk.f32.gmra.mxu1 %vm213_vm1, %v170_v21 }
  0x29   : > { %485 = vmatmul.msk.f32.gmra.mxu2 %vm213_vm1, %v170_v21  ;;  %490 = vmatmul.msk.f32.gmra.mxu3 %vm213_vm1, %v170_v21 }
  0x30   : > { %476 = vmatmul.msk.f32.gmra.mxu0 %vm213_vm1, %v171_v23  ;;  %481 = vmatmul.msk.f32.gmra.mxu1 %vm213_vm1, %v171_v23 }
  0x31   : > { %486 = vmatmul.msk.f32.gmra.mxu2 %vm213_vm1, %v171_v23  ;;  %491 = vmatmul.msk.f32.gmra.mxu3 %vm213_vm1, %v171_v23 }
  0x38   : > { %477 = vmatmul.msk.f32.gmra.mxu0 %vm213_vm1, %v172_v24  ;;  %482 = vmatmul.msk.f32.gmra.mxu1 %vm213_vm1, %v172_v24 }
  0x39   : > { %487 = vmatmul.msk.f32.gmra.mxu2 %vm213_vm1, %v172_v24  ;;  %492 = vmatmul.msk.f32.gmra.mxu3 %vm213_vm1, %v172_v24 }
  0x87   : > { %v196_v25 = vpop.permute.xlu0 %195  ;;  %v206_v41 = vpop.permute.xlu1 %205 }
  0x94   : > { %v201_v30 = vpop.permute.xlu0 %200  ;;  %v211_v54 = vpop.permute.xlu1 %210 }
  0x9d   : > { %v256_v26 = vpop.f32.mrf.mxu0  ;;  %v285_v27 = vpop.f32.mrf.mxu1 }
  0x9e   : > { %v257_v28 = vadd.f32 %v256_v26, %v196_v25  ;;  %v286_v29 = vadd.f32 %v285_v27, %v196_v25 }
  0xa0   : > { %544 = vtanh.f32 %v257_v28 }
  0xa1   : > { %546 = vtanh.f32 %v286_v29 }
  0xa4   : > { %v314_v31 = vpop.f32.mrf.mxu2  ;;  %v343_v32 = vpop.f32.mrf.mxu3 }
  0xa5   : > { %v315_v33 = vadd.f32 %v314_v31, %v196_v25  ;;  %v344_v34 = vadd.f32 %v343_v32, %v196_v25  ;;  %v259_v35 = vpop.f32.mrf.mxu0  ;;  %v288_v36 = vpop.f32.mrf.mxu1 }
  0xa6   : > { %v545_v37 = vpop.eup %544  ;;  %v260_v38 = vadd.f32 %v259_v35, %v201_v30  ;;  %v289_v39 = vadd.f32 %v288_v36, %v201_v30 }
  0xa7   : > { %v547_v40 = vpop.eup %546  ;;  %371 = vst [vmem:[%s759_s29] sm:$0xff] %v545_v37  ;;  %548 = vtanh.f32 %v315_v33 }
  0xa8   : > { %372 = vst [vmem:[%s759_s29 + $0x8] sm:$0xff] %v547_v40  ;;  %550 = vtanh.f32 %v344_v34 }
  0xa9   : > { %552 = vtanh.f32 %v260_v38 }
  0xaa   : > { %554 = vtanh.f32 %v289_v39 }
  0xac   : > { %v317_v42 = vpop.f32.mrf.mxu2  ;;  %v346_v43 = vpop.f32.mrf.mxu3 }
  0xad   : > { %v549_v44 = vpop.eup %548  ;;  %v318_v45 = vadd.f32 %v317_v42, %v201_v30  ;;  %v347_v46 = vadd.f32 %v346_v43, %v201_v30  ;;  %v262_v47 = vpop.f32.mrf.mxu0 }
  0xae   : > { %v291_v48 = vpop.f32.mrf.mxu1  ;;  %v551_v49 = vpop.eup %550  ;;  %373 = vst [vmem:[%s759_s29 + $0x10] sm:$0xff] %v549_v44  ;;  %v263_v50 = vadd.f32 %v262_v47, %v206_v41 }
  0xaf   : > { %v292_v51 = vadd.f32 %v291_v48, %v206_v41  ;;  %v553_v52 = vpop.eup %552  ;;  %375 = vst.msk [vmem:[%s759_s29 + $0x18] sm:$0xff] %vm374_vm2, %v551_v49  ;;  %556 = vtanh.f32 %v318_v45 }
  0xb0   : > { %v555_v53 = vpop.eup %554  ;;  %376 = vst [vmem:[%s759_s29 + $0x20] sm:$0xff] %v553_v52  ;;  %558 = vtanh.f32 %v347_v46 }
  0xb1   : > { %377 = vst [vmem:[%s759_s29 + $0x28] sm:$0xff] %v555_v53  ;;  %560 = vtanh.f32 %v263_v50 }
  0xb2   : > { %562 = vtanh.f32 %v292_v51 }
  0xb4   : > { %v320_v55 = vpop.f32.mrf.mxu2  ;;  %v349_v56 = vpop.f32.mrf.mxu3 }
  0xb5   : > { %v557_v57 = vpop.eup %556  ;;  %v321_v58 = vadd.f32 %v320_v55, %v206_v41  ;;  %v350_v59 = vadd.f32 %v349_v56, %v206_v41  ;;  %v265_v60 = vpop.f32.mrf.mxu0 }
  0xb6   : > { %v294_v61 = vpop.f32.mrf.mxu1  ;;  %v559_v62 = vpop.eup %558  ;;  %378 = vst [vmem:[%s759_s29 + $0x30] sm:$0xff] %v557_v57  ;;  %v266_v63 = vadd.f32 %v265_v60, %v211_v54 }
  0xb7   : > { %v295_v0 = vadd.f32 %v294_v61, %v211_v54  ;;  %v561_v1 = vpop.eup %560  ;;  %379 = vst.msk [vmem:[%s759_s29 + $0x38] sm:$0xff] %vm374_vm2, %v559_v62  ;;  %564 = vtanh.f32 %v321_v58 }
  0xb8   : > { %v563_v2 = vpop.eup %562  ;;  %380 = vst [vmem:[%s759_s29 + $0x40] sm:$0xff] %v561_v1  ;;  %566 = vtanh.f32 %v350_v59 }
  0xb9   : > { %381 = vst [vmem:[%s759_s29 + $0x48] sm:$0xff] %v563_v2  ;;  %568 = vtanh.f32 %v266_v63 }
  0xba   : > { %570 = vtanh.f32 %v295_v0 }
  0xbc   : > { %v323_v3 = vpop.f32.mrf.mxu2  ;;  %v352_v4 = vpop.f32.mrf.mxu3 }
  0xbd   : > { %v565_v5 = vpop.eup %564  ;;  %v324_v6 = vadd.f32 %v323_v3, %v211_v54  ;;  %v353_v7 = vadd.f32 %v352_v4, %v211_v54 }
  0xbe   : > { %v567_v8 = vpop.eup %566  ;;  %382 = vst [vmem:[%s759_s29 + $0x50] sm:$0xff] %v565_v5 }
  0xbf   : > { %v569_v9 = vpop.eup %568  ;;  %383 = vst.msk [vmem:[%s759_s29 + $0x58] sm:$0xff] %vm374_vm2, %v567_v8  ;;  %572 = vtanh.f32 %v324_v6 }
  0xc0   : > { %v571_v10 = vpop.eup %570  ;;  %384 = vst [vmem:[%s759_s29 + $0x60] sm:$0xff] %v569_v9  ;;  %574 = vtanh.f32 %v353_v7 }
  0xc1   : > { %385 = vst [vmem:[%s759_s29 + $0x68] sm:$0xff] %v571_v10 }
  0xc5   : > { %v573_v11 = vpop.eup %572 }
  0xc6   : > { %v575_v12 = vpop.eup %574  ;;  %386 = vst [vmem:[%s759_s29 + $0x70] sm:$0xff] %v573_v11 }
  0xc7   : > { %387 = vst.msk [vmem:[%s759_s29 + $0x78] sm:$0xff] %vm374_vm2, %v575_v12 }
  0xc8   : > { %603 = shalt.err (!%p600_p3)
}
  0xc9   : > { %s641_s25 = smov 512   ;;  %s642_s26 = smov 32  }
  0xca   : > { %500 = dma.vmem_to_hbm [thread:$0]  (%p701_p5), %s402_s16, 2048, %s404_s7, %s389_s8, %s641_s25, %s641_s25, %s642_s26  }
  0xcb PF: > { %p506_p4 = scmp.ge.s32.totalorder %s638_s15, 2  ;;  %s418_s27 = sand.u32 1, %s626_s12  }
  0xcc   : > { %s419_s28 = scalar_lea.sflag [#allocation3], %s418_s27 }
  0xcd   : > { %p503_p7 = pnand %p506_p4, %p705_p6 }
  0xcf   : > { %p504_p8 = pneg %p503_p7 }
  0xd1   : > { %621 = dma.done.wait (%p504_p8), %s419_s28, 2048  }
  0xd2   : > { %623 = vsyncadd (%p504_p8), %s419_s28, 4294965248  ;;  %p13_p9 = scmp.ge.s32.totalorder %s688_s18, 4   ;;  %s821_s12 = smov %s630_s13 }
  0xd3   : > { %s822_s13 = smov %s634_s14  ;;  %s823_s14 = smov %s699_s21 }
  0xd4   : > { %s824_s15 = smov %s688_s18  ;;  %15 = sbr.rel (!%p13_p9) target bundleno = 3 (0x3), region = 67 }
  0xd9   :  { %425 = vsyncpa [#allocation3], 1 }
  0xda   :  { %427 = vsyncpa [#allocation3 + $0x1], 1 }

</bundles_post_ra>
